<compile_context>
chip_gen: v6e
topology: v6e:2x2x1
jax: 0.10.0
libtpu: 0.0.40
codegen_flags: <defaults>
</compile_context>

<pallas_src>
import functools

import jax
import jax.numpy as jnp
from jax.experimental import pallas as pl
from jax.experimental.pallas import tpu as pltpu

LANE = 128


def ensemble_kernel(w_ref, b_ref, x_ref, o_ref):
    """w_ref: SMEM [out_dim * in_dim] (row-major); b_ref: SMEM [out_dim];
       x_ref: VMEM [in_dim, TB] (batch on lanes); o_ref: VMEM [out_dim, TB]."""
    in_dim = x_ref.shape[0]
    out_dim = o_ref.shape[0]
    for j in range(out_dim):                  # static unroll (out_dim == 1 here)
        h = x_ref[0:1, :] * w_ref[j * in_dim] + b_ref[j]
        for k in range(1, in_dim):            # static unroll (in_dim == 2 here)
            h = h + x_ref[k:k + 1, :] * w_ref[j * in_dim + k]
        o_ref[j:j + 1, :] = jax.nn.sigmoid(h).astype(o_ref.dtype)


def _round_up(n, m):
    return ((n + m - 1) // m) * m


@functools.partial(jax.jit, static_argnames=("block_b",))
def ensemble_forward(x, weight, bias, *, block_b=65536):
    """x: [B, in_dim] f32, weight: [out_dim, in_dim] f32, bias: [out_dim] f32.
    Returns sigmoid(x @ weight.T + bias) with shape [B, out_dim]."""
    B, in_dim = x.shape
    out_dim, _ = weight.shape

    # Lane-dense layout: batch on the lane axis, padded to a multiple of the
    # batch tile (itself a multiple of 128 lanes).
    bp = _round_up(B, LANE)
    tb = min(_round_up(block_b, LANE), bp)
    bp = _round_up(bp, tb)

    xt = x.T                                      # [in_dim, B]
    if bp != B:
        xt = jnp.pad(xt, ((0, 0), (0, bp - B)))   # [in_dim, bp]

    out_t = pl.pallas_call(
        ensemble_kernel,
        out_shape=jax.ShapeDtypeStruct((out_dim, bp), x.dtype),
        grid_spec=pltpu.PrefetchScalarGridSpec(
            num_scalar_prefetch=0,
            grid=(bp // tb,),
            in_specs=[
                pl.BlockSpec(memory_space=pltpu.MemorySpace.SMEM),  # weight (flat)
                pl.BlockSpec(memory_space=pltpu.MemorySpace.SMEM),  # bias
                pl.BlockSpec((in_dim, tb), lambda i: (0, i)),       # x^T tiles
            ],
            out_specs=pl.BlockSpec((out_dim, tb), lambda i: (0, i)),
        ),
        compiler_params=pltpu.CompilerParams(
            dimension_semantics=("parallel",)),
    )(weight.reshape(-1), bias, xt)

    y_t = out_t[:, :B] if bp != B else out_t
    return y_t.T                                  # [B, out_dim]


if __name__ == "__main__":
    input_dim = 2
    output_dim = 1

    key = jax.random.PRNGKey(0)
    kx, kw, kb, kx2 = jax.random.split(key, 4)

    # Deterministic "PyTorch-like" init: uniform(-1/sqrt(fan_in), 1/sqrt(fan_in))
    bound = 1.0 / (input_dim ** 0.5)
    weight = jax.random.uniform(kw, (output_dim, input_dim),
                                minval=-bound, maxval=bound, dtype=jnp.float32)
    bias = jax.random.uniform(kb, (output_dim,),
                              minval=-bound, maxval=bound, dtype=jnp.float32)

    # 1) Small batch matching the original module usage.
    x_small = jax.random.normal(kx, (8, input_dim), dtype=jnp.float32)
    y_small = jax.block_until_ready(ensemble_forward(x_small, weight, bias))
    ref_small = jax.nn.sigmoid(x_small @ weight.T + bias)
    assert y_small.shape == (8, output_dim)
    assert jnp.allclose(y_small, ref_small, atol=1e-6), "mismatch vs reference (small)"

    # 2) Non-tile-aligned batch exercising padding and a multi-step parallel grid.
    x_big = jax.random.normal(kx2, (300, input_dim), dtype=jnp.float32)
    y_big = jax.block_until_ready(
        ensemble_forward(x_big, weight, bias, block_b=256))
    ref_big = jax.nn.sigmoid(x_big @ weight.T + bias)
    assert y_big.shape == (300, output_dim)
    assert jnp.allclose(y_big, ref_big, atol=1e-6), "mismatch vs reference (big)"

    print("KERNEL_OK")
</pallas_src>

<mosaic_0001>
module attributes {stable_mosaic.version = 11 : i64} {
  func.func @ensemble_kernel(%arg0: i32, %arg1: memref<2xf32, #tpu.memory_space<smem>>, %arg2: memref<1xf32, #tpu.memory_space<smem>>, %arg3: memref<2x128xf32, #tpu.memory_space<vmem>>, %arg4: memref<1x128xf32, #tpu.memory_space<vmem>>) attributes {dimension_semantics = [#tpu.dimension_semantics<parallel>], iteration_bounds = array<i64: 1>, scalar_prefetch = 0 : i64, scratch_operands = 0 : i64, tpu.core_type = #tpu.core_type<tc>, window_params = [{transform_indices = @transform_0, window_bounds = array<i64: 2>}, {transform_indices = @transform_1, window_bounds = array<i64: 1>}, {transform_indices = @transform_2, window_bounds = array<i64: 2, 128>}, {transform_indices = @transform_3, window_bounds = array<i64: 1, 128>}]} {
    %c0 = arith.constant 0 : index
    %c0_0 = arith.constant 0 : index
    %0 = vector.load %arg3[%c0, %c0_0] : memref<2x128xf32, #tpu.memory_space<vmem>>, vector<1x128xf32>
    %c0_1 = arith.constant 0 : index
    %1 = memref.load %arg1[%c0_1] : memref<2xf32, #tpu.memory_space<smem>>
    %2 = vector.broadcast %1 : f32 to vector<1x128xf32>
    %3 = arith.mulf %0, %2 : vector<1x128xf32>
    %c0_2 = arith.constant 0 : index
    %4 = memref.load %arg2[%c0_2] : memref<1xf32, #tpu.memory_space<smem>>
    %5 = vector.broadcast %4 : f32 to vector<1x128xf32>
    %6 = arith.addf %3, %5 : vector<1x128xf32>
    %c1 = arith.constant 1 : index
    %c0_3 = arith.constant 0 : index
    %7 = vector.load %arg3[%c1, %c0_3] : memref<2x128xf32, #tpu.memory_space<vmem>>, vector<1x128xf32>
    %c1_4 = arith.constant 1 : index
    %8 = memref.load %arg1[%c1_4] : memref<2xf32, #tpu.memory_space<smem>>
    %9 = vector.broadcast %8 : f32 to vector<1x128xf32>
    %10 = arith.mulf %7, %9 : vector<1x128xf32>
    %11 = arith.addf %6, %10 : vector<1x128xf32>
    %12 = arith.negf %11 : vector<1x128xf32>
    %13 = math.exp %12 : vector<1x128xf32>
    %cst = arith.constant 1.000000e+00 : f32
    %14 = vector.broadcast %cst : f32 to vector<1x128xf32>
    %15 = arith.addf %14, %13 : vector<1x128xf32>
    %16 = arith.divf %14, %15 : vector<1x128xf32>
    %c0_5 = arith.constant 0 : index
    %c0_6 = arith.constant 0 : index
    %17 = vector.load %arg4[%c0_5, %c0_6] : memref<1x128xf32, #tpu.memory_space<vmem>>, vector<1x128xf32>
    tpu.vector_store %arg4[%c0_5, %c0_6], %16 {strides = array<i32>} : memref<1x128xf32, #tpu.memory_space<vmem>>, vector<1x128xf32>,
    return
  }
  func.func @transform_0(%arg0: i32) -> i32 {
    %c0_i32 = arith.constant 0 : i32
    %c0_i32_0 = arith.constant 0 : i32
    return %c0_i32 : i32
  }
  func.func @transform_1(%arg0: i32) -> i32 {
    %c0_i32 = arith.constant 0 : i32
    %c0_i32_0 = arith.constant 0 : i32
    return %c0_i32 : i32
  }
  func.func @transform_2(%arg0: i32) -> (i32, i32) {
    %c0_i32 = arith.constant 0 : i32
    %c0_i32_0 = arith.constant 0 : i32
    return %c0_i32, %arg0 : i32, i32
  }
  func.func @transform_3(%arg0: i32) -> (i32, i32) {
    %c0_i32 = arith.constant 0 : i32
    %c0_i32_0 = arith.constant 0 : i32
    return %c0_i32, %arg0 : i32, i32
  }
}

</mosaic_0001>

<bundles_post_ra>
// kernel: ensemble_forward.1
= control target key start
LH: loop header
LB: loop body
LE: loop exit
PB: predicated region body
PF: predicated region fallthrough
CT: control target
= control target key end

     0   :  { %9 = vsyncpa [#allocation4], 0  ;;  %s109_s0 = inlined_call_operand.vmem [shape: f32[2], index: 0, kind: input, shape index: {}]   ;;  %s110_s1 = inlined_call_operand.<no memory space> [shape: f32[1], index: 1, kind: input, shape index: {}]   ;;  %s111_s2 = inlined_call_operand.vmem [shape: f32[2,128], index: 2, kind: input, shape index: {}]   ;;  %s112_s3 = inlined_call_operand.vmem [shape: f32[1,128], index: 3, kind: output, shape index: {}]  }
   0x1   :  { %s16_s14 = sshll.u32 %s109_s0, 4  ;;  %s17_s14 = int_to_ptr.vmem [resolvable:$true] %s16_s14 }
   0x2   :  { %s59_s15 = scalar_lea.vmem %s17_s14, 16  ;;  %p64_p1 = scmp.lt.s32.totalorder %s17_s14, %s17_s14 }
   0x3   :  { %p60_p0 = scmp.ne.s32.totalorder %s17_s14, %s59_s15  ;;  %p65_p2 = scmp.lt.s32.totalorder %s59_s15, %s59_s15 }
   0x5   :  { %p66_p3 = por %p65_p2, %p64_p1 }
   0x7   :  { %p67_p4 = pnand %p66_p3, %p60_p0 }
   0x9   :  { %70 = shalt.err (!%p67_p4)
}
   0xa   :  { %s73_s16 = smov [#allocation3]  }
   0xb   :  { %19 = dma.vmem_to_smem %s17_s14, 16, %s73_s16, [#allocation4]  }
   0xc   :  { %71 = dma.done.wait [#allocation4], 16  }
   0xd   :  { %72 = vsyncadd [#allocation4], 4294967280 }
   0xe   :  { %27 = sfence }
   0xf   :  { %s29_s17 = sld [smem:[#allocation3]]  ;;  %v28_v0 = vld [vmem:[%s111_s2] sm:$0x1]  ;;  %v35_v1 = vld [vmem:[%s111_s2 + $0x1] sm:$0x1]  ;;  %v33_v3 = vstv %s110_s1 }
  0x10   :  { %s52_s18 = sld [smem:[#allocation3 + $0x1]] }
  0x15   :  { %v30_v2 = vstv %s29_s17 }
  0x16   :  { %v31_v4 = vmul.f32 %v30_v2, %v28_v0  ;;  %v37_v5 = vstv %s52_s18 }
  0x17   :  { %v38_v6 = vmul.f32 %v37_v5, %v35_v1 }
  0x18   :  { %v34_v7 = vadd.f32 %v33_v3, %v31_v4 }
  0x1a   :  { %v39_v8 = vadd.f32 %v38_v6, %v34_v7 }
  0x1c   :  { %v53_v9 = vmul.f32 -1.442695, %v39_v8 }
  0x1e   :  { %55 = vpow2.f32 %v53_v9 }
  0x2b   :  { %v56_v10 = vpop.eup %55 }
  0x2c   :  { %v43_v11 = vadd.f32 1.0, %v56_v10 }
  0x2e   :  { %57 = vrcp.f32 %v43_v11 }
  0x3b   :  { %v58_v12 = vpop.eup %57 }
  0x3c   :  { %46 = vst [vmem:[%s112_s3] sm:$0x1] %v58_v12 }
  0x3d   :  { %51 = vsyncpa [#allocation4], 1 }

</bundles_post_ra>
